<compile_context>
chip_gen: v7x
topology: tpu7x:2x2x1
jax: 0.10.0
libtpu: 0.0.40
codegen_flags: <defaults>
</compile_context>

<pallas_src>
import functools

import numpy as np
import jax
import jax.numpy as jnp
from jax import lax
from jax.experimental import pallas as pl
from jax.experimental.pallas import tpu as pltpu


def _round_up(x, m):
    return ((x + m - 1) // m) * m


# ----------------------------- kernels ---------------------------------------

def _value_kernel_1(x_ref, w_ref, b_ref, o_ref):
    # o^T[8, TB] = w^T[8, K] @ x[TB, K]^T + b   (NT matmul, q@k^T style).
    # Only row 0 of w^T / o^T is the real head; rows 1..7 are zero padding so
    # the output stays 8-sublane aligned.
    o_ref[...] = lax.dot_general(
        w_ref[...], x_ref[...],
        dimension_numbers=(((1,), (1,)), ((), ())),
        preferred_element_type=jnp.float32,
    ) + b_ref[...]


def _value_kernel_2(x_ref, w1_ref, b1_ref, w2_ref, b2_ref, o_ref):
    # Hidden layer: standard (TB, K) @ (K, 128) MXU matmul + sublane-broadcast
    # bias + relu.  Hidden lanes 64..127 are zero (weights & bias zero-padded).
    h = jnp.maximum(
        jnp.dot(x_ref[...], w1_ref[...], preferred_element_type=jnp.float32)
        + b1_ref[...],
        0.0,
    )
    # Value head, transposed: o^T[8, TB] = w2^T[8, 128] @ h[TB, 128]^T + b2.
    o_ref[...] = lax.dot_general(
        w2_ref[...], h,
        dimension_numbers=(((1,), (1,)), ((), ())),
        preferred_element_type=jnp.float32,
    ) + b2_ref[...]


# --------------------------- jitted forward ----------------------------------

@functools.partial(jax.jit, static_argnames=("n_inputs", "layers"))
def _value_forward(x, params, *, n_inputs, layers):
    lead = x.shape[:-1]
    x = jnp.reshape(x, (-1, n_inputs)).astype(jnp.float32)
    B = x.shape[0]
    if B == 0:                                        # guard empty batch
        return jnp.zeros(lead + (1,), jnp.float32)

    # Batch tiling (see header comment).
    if B <= 256:
        tb = B                                        # exact single tile
    else:
        tb = min(1024, _round_up(pl.cdiv(B, 2), 128))  # >=2 tiles, mult of 128
    n_tiles = pl.cdiv(B, tb)                          # last tile may be ragged

    x_spec = pl.BlockSpec((tb, n_inputs), lambda i: (i, 0))
    o_spec = pl.BlockSpec((8, tb), lambda i: (0, i))
    resident = lambda shp: pl.BlockSpec(shp, lambda i: (0, 0))  # weights stay put
    cparams = pltpu.CompilerParams(dimension_semantics=("parallel",))
    out_shape = jax.ShapeDtypeStruct((8, B), jnp.float32)

    if layers == 1:
        w_t, b_col = params
        out_t = pl.pallas_call(
            _value_kernel_1,
            out_shape=out_shape,
            grid=(n_tiles,),
            in_specs=[x_spec, resident(w_t.shape), resident(b_col.shape)],
            out_specs=o_spec,
            compiler_params=cparams,
        )(x, w_t, b_col)
    else:
        w1p, b1v, w2t, b2_col = params
        out_t = pl.pallas_call(
            _value_kernel_2,
            out_shape=out_shape,
            grid=(n_tiles,),
            in_specs=[x_spec, resident(w1p.shape), resident(b1v.shape),
                      resident(w2t.shape), resident(b2_col.shape)],
            out_specs=o_spec,
            compiler_params=cparams,
        )(x, w1p, b1v, w2t, b2_col)

    # Row 0 of the transposed output is the value head.
    return out_t[0, :].reshape(lead + (1,))


# --------------------------- wrapper / module --------------------------------

class ValuePallas:
    """Pallas-TPU implementation of Value.forward."""

    HIDDEN = 64
    LANES = 128

    def __init__(self, n_inputs, layers=1, seed=0):
        self.n_inputs = n_inputs
        self.layers = layers

        key = jax.random.PRNGKey(seed)

        def xavier_normal(k, fan_in, fan_out):
            std = np.sqrt(2.0 / (fan_in + fan_out))
            # stored as (in, out) -> forward computes x @ W
            return std * jax.random.normal(k, (fan_in, fan_out), jnp.float32)

        def bias_uniform(k, fan_in, n):
            bound = 1.0 / np.sqrt(fan_in)
            return jax.random.uniform(k, (n,), jnp.float32, -bound, bound)

        ks = jax.random.split(key, 4)

        if layers == 1:
            # raw params (for the reference)
            self.w = xavier_normal(ks[0], n_inputs, 1)
            self.b = bias_uniform(ks[1], n_inputs, 1)
            # head weight, transposed + sublane-padded to 8 rows (row 0 = real)
            w_t = jnp.zeros((8, n_inputs), jnp.float32).at[0, :].set(self.w[:, 0])
            b_col = jnp.broadcast_to(self.b.reshape(1, 1), (8, 1)).astype(jnp.float32)
            self._params = (jax.device_put(w_t), jax.device_put(b_col))
        else:
            H, L = self.HIDDEN, self.LANES
            self.w1 = xavier_normal(ks[0], n_inputs, H)
            self.b1 = bias_uniform(ks[1], n_inputs, H)
            self.w2 = xavier_normal(ks[2], H, 1)
            self.b2 = bias_uniform(ks[3], H, 1)
            # hidden weight / bias, lane-padded 64 -> 128 (zero pad is neutral
            # through relu and the zeroed head columns)
            w1p = jnp.zeros((n_inputs, L), jnp.float32).at[:, :H].set(self.w1)
            b1v = jnp.zeros((1, L), jnp.float32).at[0, :H].set(self.b1)
            # head weight, transposed + padded: row 0 lanes [0,64) = w2
            w2t = jnp.zeros((8, L), jnp.float32).at[0, :H].set(self.w2[:, 0])
            b2_col = jnp.broadcast_to(self.b2.reshape(1, 1), (8, 1)).astype(jnp.float32)
            self._params = (jax.device_put(w1p), jax.device_put(b1v),
                            jax.device_put(w2t), jax.device_put(b2_col))

    def __call__(self, x):
        return _value_forward(
            x, self._params, n_inputs=self.n_inputs, layers=self.layers
        )

    # pure-numpy reference (true f32) for verification
    def reference(self, x):
        x = np.asarray(x, np.float32).reshape(-1, self.n_inputs)
        if self.layers == 1:
            return x @ np.asarray(self.w) + np.asarray(self.b)
        h = np.maximum(x @ np.asarray(self.w1) + np.asarray(self.b1), 0.0)
        return h @ np.asarray(self.w2) + np.asarray(self.b2)


# ------------------------------- main -----------------------------------------

if __name__ == "__main__":
    n_inputs = 16
    key = jax.random.PRNGKey(0)

    ok = True
    for layers in (1, 2):
        value = ValuePallas(n_inputs, layers=layers, seed=0)
        # batch=8  -> tiny single-tile path (typical RL rollout batch)
        # batch=320 -> multi-tile "parallel" grid with a ragged last tile
        for batch in (8, 320):
            kx = jax.random.fold_in(key, 10 * layers + (0 if batch == 8 else 1))
            x = jax.random.normal(kx, (batch, n_inputs), jnp.float32)

            v = jax.block_until_ready(value(x))
            v_ref = value.reference(x)

            ok &= v.shape == (batch, 1)
            ok &= bool(np.allclose(np.asarray(v), v_ref, rtol=1e-4, atol=1e-4))

    print("KERNEL_OK" if ok else "MISMATCH")
</pallas_src>

<mosaic_0001>
module attributes {stable_mosaic.version = 11 : i64} {
  func.func @_value_kernel_1(%arg0: i32, %arg1: memref<8x16xf32, #tpu.memory_space<vmem>>, %arg2: memref<8x16xf32, #tpu.memory_space<vmem>>, %arg3: memref<8x1xf32, #tpu.memory_space<vmem>>, %arg4: memref<8x8xf32, #tpu.memory_space<vmem>>) attributes {dimension_semantics = [#tpu.dimension_semantics<parallel>], iteration_bounds = array<i64: 1>, scalar_prefetch = 0 : i64, scratch_operands = 0 : i64, tpu.core_type = #tpu.core_type<tc>, window_params = [{transform_indices = @transform_0, window_bounds = array<i64: 8, 16>}, {pipeline_mode = #tpu.pipeline_mode<synchronous>, transform_indices = @transform_1, window_bounds = array<i64: 8, 16>}, {pipeline_mode = #tpu.pipeline_mode<synchronous>, transform_indices = @transform_2, window_bounds = array<i64: 8, 1>}, {transform_indices = @transform_3, window_bounds = array<i64: 8, 8>}]} {
    %c0 = arith.constant 0 : index
    %c0_0 = arith.constant 0 : index
    %0 = vector.load %arg2[%c0, %c0_0] : memref<8x16xf32, #tpu.memory_space<vmem>>, vector<8x16xf32>
    %c0_1 = arith.constant 0 : index
    %c0_2 = arith.constant 0 : index
    %1 = vector.load %arg1[%c0_1, %c0_2] : memref<8x16xf32, #tpu.memory_space<vmem>>, vector<8x16xf32>
    %cst = arith.constant dense<0.000000e+00> : vector<8x8xf32>
    %2 = tpu.matmul %0, %1, %cst {dimension_numbers = #tpu.dot_dimension_numbers<[1], [1], [0], [0], [0, 0, 1, 0], [], []>} : vector<8x16xf32>, vector<8x16xf32>, vector<8x8xf32> -> vector<8x8xf32>
    %c0_3 = arith.constant 0 : index
    %c0_4 = arith.constant 0 : index
    %3 = vector.load %arg3[%c0_3, %c0_4] : memref<8x1xf32, #tpu.memory_space<vmem>>, vector<8x1xf32>
    %4 = vector.broadcast %3 : vector<8x1xf32> to vector<8x8xf32>
    %5 = arith.addf %2, %4 : vector<8x8xf32>
    %c0_5 = arith.constant 0 : index
    %c0_6 = arith.constant 0 : index
    %6 = vector.load %arg4[%c0_5, %c0_6] : memref<8x8xf32, #tpu.memory_space<vmem>>, vector<8x8xf32>
    tpu.vector_store %arg4[%c0_5, %c0_6], %5 {strides = array<i32>} : memref<8x8xf32, #tpu.memory_space<vmem>>, vector<8x8xf32>,
    return
  }
  func.func @transform_0(%arg0: i32) -> (i32, i32) {
    %c0_i32 = arith.constant 0 : i32
    %c0_i32_0 = arith.constant 0 : i32
    return %arg0, %c0_i32 : i32, i32
  }
  func.func @transform_1(%arg0: i32) -> (i32, i32) {
    %c0_i32 = arith.constant 0 : i32
    %c0_i32_0 = arith.constant 0 : i32
    %c0_i32_1 = arith.constant 0 : i32
    return %c0_i32, %c0_i32_0 : i32, i32
  }
  func.func @transform_2(%arg0: i32) -> (i32, i32) {
    %c0_i32 = arith.constant 0 : i32
    %c0_i32_0 = arith.constant 0 : i32
    %c0_i32_1 = arith.constant 0 : i32
    return %c0_i32, %c0_i32_0 : i32, i32
  }
  func.func @transform_3(%arg0: i32) -> (i32, i32) {
    %c0_i32 = arith.constant 0 : i32
    %c0_i32_0 = arith.constant 0 : i32
    return %c0_i32, %arg0 : i32, i32
  }
}

</mosaic_0001>

<bundles_post_ra>
// kernel: _value_forward.1
= control target key start
LH: loop header
LB: loop body
LE: loop exit
PB: predicated region body
PF: predicated region fallthrough
CT: control target
= control target key end

     0   :  { %8 = vsyncpa [#allocation3], 0  ;;  %s156_s12 = smov [#allocation2]   ;;  %s201_s0 = inlined_call_operand.vmem [shape: f32[8,16], index: 0, kind: input, shape index: {}]   ;;  %s202_s1 = inlined_call_operand.hbm [shape: f32[8,16], index: 1, kind: input, shape index: {}]   ;;  %s203_s2 = inlined_call_operand.vmem [shape: f32[8,1], index: 2, kind: input, shape index: {}]   ;;  %s204_s3 = inlined_call_operand.vmem [shape: f32[8,8], index: 3, kind: output, shape index: {}]  }
   0x1   :  { %s17_s13 = sshll.u32 %s156_s12, 4  ;;  %s132_s16 = scalar_lea.hbm %s202_s1, 128  ;;  %s18_s13 = int_to_ptr.vmem [resolvable:$true] %s17_s13 }
   0x2   :  { %p133_p0 = scmp.ne.s32.totalorder %s202_s1, %s132_s16  ;;  %p136_p1 = scmp.lt.u32.totalorder %s132_s16, %s202_s1 }
   0x4   :  { %p138_p2 = pnand %p136_p1, %p133_p0 }
   0x6   :  { %141 = shalt.err (!%p138_p2)
}
   0x7   :  { %s142_s21 = scalar_lea.vmem %s18_s13, 128  ;;  %p147_p4 = scmp.lt.s32.totalorder %s18_s13, %s18_s13 }
   0x8   :  { %p143_p3 = scmp.ne.s32.totalorder %s18_s13, %s142_s21  ;;  %p148_p5 = scmp.lt.s32.totalorder %s142_s21, %s142_s21 }
   0xa   :  { %p149_p6 = por %p148_p5, %p147_p4 }
   0xc   :  { %p150_p7 = pnand %p149_p6, %p143_p3 }
   0xe   :  { %153 = shalt.err (!%p150_p7)
}
   0xf   :  { %20 = dma.hbm_to_vmem [thread:$0]  %s202_s1, 128, %s18_s13, [#allocation3]  }
  0x10   :  { %154 = dma.done.wait [#allocation3], 128  }
  0x11   :  { %155 = vsyncadd [#allocation3], 4294967168  ;;  %v157_v0 = vmov 0.0   ;;  %vm158_vm0 = vmmov 0   ;;  %v159_v1 = vmov 0   ;;  %vm34_vm1 = vcmask 130048  }
  0x12   :  { %122 = vmatprep.subr.mxu0 %v157_v0  ;;  %124 = vmatprep.mubr.msk.f32.mxu0 %vm158_vm0, %v157_v0  ;;  %v27_v2 = vld [vmem:[%s201_s0] sm:$0xff]  ;;  %vm111_vm2 = vcmask 64512  }
  0x13   :  { %131 = vset.pattern.permute.xlu0 %v159_v1  ;;  %v28_v3 = vld [vmem:[%s203_s2] sm:$0xff]  ;;  %123 = vmatpush3.xpose.msk.msra.mxu0 %vm34_vm1, %v27_v2 }
  0x14   :  { %v26_v4 = vld [vmem:[#allocation2] sm:$0xff]  ;;  %31 = vperm.xlu0 %131, %v28_v3  }
  0x16   :  { %125 = vmatmul.mubr.msk.f32.vlgmr.msra.gmra.mrb[0].mxu0 %vm34_vm1, %v26_v4 }
  0x93   :  { %v32_v5 = vpop.permute.xlu0 %31 }
  0xe9   :  { %v107_v6 = vpop.f32.mrb[0].mxu0 }
  0xea   :  { %v108_v7 = vadd.f32 %v107_v6, %v32_v5  ;;  %v126_v8 = vpop.f32.mrb[1].mxu0 }
  0xec   :  { %112 = vst.msk [vmem:[%s204_s3] sm:$0xff] %vm111_vm2, %v108_v7 }
  0xed   :  { %117 = vsyncpa [#allocation3], 1 }

</bundles_post_ra>
